<compile_context>
chip_gen: v7x
topology: tpu7x:2x2x1
jax: 0.10.0
libtpu: 0.0.40
codegen_flags: <defaults>
</compile_context>

<pallas_src>
import math

import numpy as np
import jax
import jax.numpy as jnp
from jax.experimental import pallas as pl
from jax.experimental.pallas import tpu as pltpu


def _round_up(x, m):
    return ((x + m - 1) // m) * m


def _pick_tile(total, max_tile, quantum):
    """Largest multiple of `quantum` that divides `total` and is <= max_tile."""
    t = min(total, max_tile)
    t = (t // quantum) * quantum
    while total % t != 0:
        t -= quantum
    return t


def _vmem_cap_bytes():
    # Generation-aware VMEM budget: ~60% of physical capacity (v5e/v6e: 128 MiB,
    # v7x: 64 MiB) so the same block sizes stay safe across chips.
    try:
        return int(0.6 * pltpu.get_tpu_info().vmem_capacity_bytes)
    except Exception:
        return 32 << 20


# ------------------------------ Pallas kernel --------------------------------

def _pimkl_matmul_kernel(x_ref, w_ref, o_ref, acc_ref):
    # out[i, j] = sum_k x[i, k] @ W[k, j]   (K = last, "arbitrary" grid axis)
    k = pl.program_id(2)

    @pl.when(k == 0)
    def _():
        acc_ref[...] = jnp.zeros_like(acc_ref)

    acc_ref[...] += jnp.dot(x_ref[...], w_ref[...],
                            preferred_element_type=jnp.float32)

    @pl.when(k == pl.num_programs(2) - 1)
    def _():
        o_ref[...] = acc_ref[...]   # output is f32: no astype / extra vreg copy


def pimkl_project(x, w, *, max_bm=256, max_tn=512, max_tk=512):
    """out = x @ W on the MXU.  x: (batch, num_nodes), W: (num_nodes, n_out)."""
    batch, num_nodes = x.shape
    k_dim, n_out = w.shape
    assert k_dim == num_nodes

    compute_dtype = w.dtype
    itemsize = jnp.dtype(compute_dtype).itemsize
    sublane = 8 * (4 // itemsize)          # 8 rows for f32, 16 for bf16

    b_pad = _round_up(batch, sublane)
    k_pad = _round_up(num_nodes, 128)
    n_pad = _round_up(n_out, 128)

    bm = _pick_tile(b_pad, max_bm, sublane)
    tk = _pick_tile(k_pad, max_tk, 128)
    tn = _pick_tile(n_pad, max_tn, 128)

    # Single padded copies (zero padding contributes exactly zero to the GEMM).
    x_p = jnp.zeros((b_pad, k_pad), compute_dtype).at[:batch, :num_nodes].set(
        x.astype(compute_dtype))
    w_p = jnp.zeros((k_pad, n_pad), compute_dtype).at[:num_nodes, :n_out].set(w)

    grid = (b_pad // bm, n_pad // tn, k_pad // tk)

    # VMEM limit derived from the chosen block shapes: double-buffered inputs,
    # double-buffered f32 output block, f32 accumulator, 2x headroom, capped
    # relative to this chip's physical VMEM.
    vmem_needed = 2 * (bm * tk + tk * tn) * itemsize + 3 * bm * tn * 4
    vmem_limit = int(min(max(2 * vmem_needed, 16 << 20), _vmem_cap_bytes()))

    cost = pl.CostEstimate(
        flops=2 * b_pad * k_pad * n_pad,
        transcendentals=0,
        bytes_accessed=(x_p.size * itemsize + w_p.size * itemsize
                        + b_pad * n_pad * 4),
    )

    out_p = pl.pallas_call(
        _pimkl_matmul_kernel,
        out_shape=jax.ShapeDtypeStruct((b_pad, n_pad), jnp.float32),
        grid_spec=pltpu.PrefetchScalarGridSpec(
            num_scalar_prefetch=0,
            grid=grid,
            in_specs=[
                pl.BlockSpec((bm, tk), lambda i, j, k: (i, k)),
                pl.BlockSpec((tk, tn), lambda i, j, k: (k, j)),
            ],
            out_specs=pl.BlockSpec((bm, tn), lambda i, j, k: (i, j)),
            scratch_shapes=[pltpu.VMEM((bm, tn), jnp.float32)],
        ),
        compiler_params=pltpu.CompilerParams(
            # TODO(synk): on v7x evaluate pltpu.CORE_PARALLEL on the batch axis
            # to engage both TensorCores; "parallel" is a safe no-op elsewhere.
            dimension_semantics=("parallel", "parallel", "arbitrary"),
            vmem_limit_bytes=vmem_limit,
        ),
        cost_estimate=cost,
    )(x_p, w_p)

    return out_p[:batch, :n_out]


# ------------------------- plain-JAX glue / params --------------------------

def matrix_inverse_sqrt(k, eps=0.01):
    # TODO(synk): torch.linalg.eigh has no Pallas equivalent; the matrix is a
    # tiny (num_anchors x num_anchors), batch-independent factor -> plain JAX.
    e, v = jnp.linalg.eigh(k)
    e = jnp.clip(e, 0.0, None)
    e_rsqrt = 1.0 / (jnp.sqrt(e) + eps)
    return v @ (v.T * e_rsqrt[:, None])


def build_pimkl_weight(indices_list, laplacians, anchors_list, num_nodes,
                       *, compute_dtype=jnp.bfloat16):
    """Batch-independent scattered weight W (num_nodes, P*num_anchors) with
    W[idx_p, p*m:(p+1)*m] = L_p @ A_p^T @ K_ZZ^{-1/2}.

    Folding the per-pathway gather + kernel evaluation + Nystroem projection
    into one matrix makes the per-batch hot path a single MXU matmul x @ W.
    Recomputed on every call (training mode: _need_lintrans_computed=True).
    W is cast to compute_dtype exactly once here.
    """
    num_anchors = anchors_list[0].shape[0]
    p_total = len(indices_list)
    w = jnp.zeros((num_nodes, p_total * num_anchors), jnp.float32)
    for p, (idx, lap, anchors) in enumerate(
            zip(indices_list, laplacians, anchors_list)):
        la_t = lap @ anchors.T                   # (n_p, m)  L @ A^T
        kzz = anchors @ la_t                     # (m, m)    A @ L @ A^T (tiny)
        lintrans = matrix_inverse_sqrt(kzz)      # (m, m)    K_ZZ^{-1/2}
        m_p = la_t @ lintrans                    # (n_p, m)
        w = w.at[idx, p * num_anchors:(p + 1) * num_anchors].set(m_p)
    return w.astype(compute_dtype)


def pimkl_forward(x, indices_list, laplacians, anchors_list, *,
                  compute_dtype=jnp.bfloat16):
    """Equivalent of PIMKLLayer.forward (training mode: lintrans recomputed)."""
    num_nodes = x.shape[1]
    w = build_pimkl_weight(indices_list, laplacians, anchors_list, num_nodes,
                           compute_dtype=compute_dtype)
    return pimkl_project(x, w)


def pimkl_forward_ref(x, indices_list, laplacians, anchors_list):
    """Pure-JAX reference mirroring the PyTorch math exactly."""
    outs = []
    for idx, lap, anchors in zip(indices_list, laplacians, anchors_list):
        x_sel = x[:, idx]
        kx = x_sel @ lap @ anchors.T
        kzz = anchors @ lap @ anchors.T
        lt = matrix_inverse_sqrt(kzz)
        outs.append(kx @ lt)
    return jnp.concatenate(outs, axis=1)


def make_laplacian(key, n):
    """Synthetic symmetric PSD graph Laplacian  L = D - W."""
    w = jax.random.uniform(key, (n, n), dtype=jnp.float32)
    w = 0.5 * (w + w.T)
    w = w * (1.0 - jnp.eye(n, dtype=jnp.float32))
    d = jnp.diag(jnp.sum(w, axis=1))
    return (d - w).astype(jnp.float32)


def kaiming_uniform_anchors(key, num_anchors, fan_in):
    """kaiming_uniform_(a=sqrt(5)) -> U(-1/sqrt(fan_in), 1/sqrt(fan_in))."""
    bound = 1.0 / math.sqrt(fan_in)
    return jax.random.uniform(
        key, (num_anchors, fan_in), minval=-bound, maxval=bound,
        dtype=jnp.float32,
    )


# --------------------------------- main --------------------------------------

if __name__ == "__main__":
    key = jax.random.PRNGKey(0)

    batch = 8
    num_nodes = 32
    num_anchors = 4
    pathway_sizes = [8, 12]          # two pathway-induced kernels

    key, kx = jax.random.split(key)
    x = jax.random.normal(kx, (batch, num_nodes), dtype=jnp.float32)

    indices_list, laplacians, anchors_list = [], [], []
    rng_np = np.random.RandomState(0)
    for n_i in pathway_sizes:
        key, kl, ka = jax.random.split(key, 3)
        idx = np.sort(
            rng_np.choice(num_nodes, size=n_i, replace=False)).astype(np.int32)
        indices_list.append(jnp.asarray(idx))
        laplacians.append(make_laplacian(kl, n_i))
        anchors_list.append(kaiming_uniform_anchors(ka, num_anchors, n_i))

    ref = jax.block_until_ready(
        pimkl_forward_ref(x, indices_list, laplacians, anchors_list))
    ref_np = np.asarray(ref)
    out_dim = num_anchors * len(pathway_sizes)

    # f32 path: tight comparison against the reference.
    out_f32 = jax.block_until_ready(
        pimkl_forward(x, indices_list, laplacians, anchors_list,
                      compute_dtype=jnp.float32))
    assert out_f32.shape == (batch, out_dim), out_f32.shape
    assert np.allclose(np.asarray(out_f32), ref_np, rtol=1e-3, atol=1e-3), (
        "Pallas f32 output mismatch vs reference")

    # bf16 default path (recommended on all generations): scale-aware check.
    out_bf16 = jax.block_until_ready(
        pimkl_forward(x, indices_list, laplacians, anchors_list))
    out_bf16_np = np.asarray(out_bf16)
    assert out_bf16.shape == (batch, out_dim), out_bf16.shape
    assert np.all(np.isfinite(out_bf16_np))
    scale = max(float(np.max(np.abs(ref_np))), 1.0)
    assert np.allclose(out_bf16_np, ref_np, rtol=5e-2, atol=5e-2 * scale), (
        "Pallas bf16 output mismatch vs reference (loose check)")

    print("KERNEL_OK")
</pallas_src>

<mosaic_0001>
module attributes {stable_mosaic.version = 11 : i64} {
  func.func @_pimkl_matmul_kernel(%arg0: i32, %arg1: i32, %arg2: i32, %arg3: memref<8x128xf32, #tpu.memory_space<vmem>>, %arg4: memref<128x128xf32, #tpu.memory_space<vmem>>, %arg5: memref<8x128xf32, #tpu.memory_space<vmem>>, %arg6: memref<8x128xf32, #tpu.memory_space<vmem>>) attributes {dimension_semantics = [#tpu.dimension_semantics<parallel>, #tpu.dimension_semantics<parallel>, #tpu.dimension_semantics<arbitrary>], iteration_bounds = array<i64: 1, 1, 1>, scalar_prefetch = 0 : i64, scratch_operands = 1 : i64, tpu.core_type = #tpu.core_type<tc>, window_params = [{transform_indices = @transform_0, window_bounds = array<i64: 8, 128>}, {transform_indices = @transform_1, window_bounds = array<i64: 128, 128>}, {transform_indices = @transform_2, window_bounds = array<i64: 8, 128>}]} {
    %c0_i32 = arith.constant 0 : i32
    %0 = arith.cmpi eq, %arg2, %c0_i32 : i32
    %1 = arith.extui %0 : i1 to i32
    %c0_i32_0 = arith.constant 0 : i32
    %2 = arith.cmpi ne, %1, %c0_i32_0 : i32
    scf.if %2 {
      %cst_10 = arith.constant 0.000000e+00 : f32
      %12 = vector.broadcast %cst_10 : f32 to vector<8x128xf32>
      %c0_11 = arith.constant 0 : index
      %c0_12 = arith.constant 0 : index
      %13 = vector.load %arg6[%c0_11, %c0_12] : memref<8x128xf32, #tpu.memory_space<vmem>>, vector<8x128xf32>
      tpu.vector_store %arg6[%c0_11, %c0_12], %12 {strides = array<i32>} : memref<8x128xf32, #tpu.memory_space<vmem>>, vector<8x128xf32>,
    } else {
    }
    %c0 = arith.constant 0 : index
    %c0_1 = arith.constant 0 : index
    %3 = vector.load %arg6[%c0, %c0_1] : memref<8x128xf32, #tpu.memory_space<vmem>>, vector<8x128xf32>
    %c0_2 = arith.constant 0 : index
    %c0_3 = arith.constant 0 : index
    %4 = vector.load %arg3[%c0_2, %c0_3] : memref<8x128xf32, #tpu.memory_space<vmem>>, vector<8x128xf32>
    %c0_4 = arith.constant 0 : index
    %c0_5 = arith.constant 0 : index
    %5 = vector.load %arg4[%c0_4, %c0_5] : memref<128x128xf32, #tpu.memory_space<vmem>>, vector<128x128xf32>
    %cst = arith.constant dense<0.000000e+00> : vector<8x128xf32>
    %6 = tpu.matmul %4, %5, %cst {dimension_numbers = #tpu.dot_dimension_numbers<[1], [0], [0], [1], [0, 0, 1, 1], [], []>} : vector<8x128xf32>, vector<128x128xf32>, vector<8x128xf32> -> vector<8x128xf32>
    %7 = arith.addf %3, %6 : vector<8x128xf32>
    %c0_6 = arith.constant 0 : index
    %c0_7 = arith.constant 0 : index
    %8 = vector.load %arg6[%c0_6, %c0_7] : memref<8x128xf32, #tpu.memory_space<vmem>>, vector<8x128xf32>
    tpu.vector_store %arg6[%c0_6, %c0_7], %7 {strides = array<i32>} : memref<8x128xf32, #tpu.memory_space<vmem>>, vector<8x128xf32>,
    %c0_i32_8 = arith.constant 0 : i32
    %9 = arith.cmpi eq, %arg2, %c0_i32_8 : i32
    %10 = arith.extui %9 : i1 to i32
    %c0_i32_9 = arith.constant 0 : i32
    %11 = arith.cmpi ne, %10, %c0_i32_9 : i32
    scf.if %11 {
      %c0_10 = arith.constant 0 : index
      %c0_11 = arith.constant 0 : index
      %12 = vector.load %arg6[%c0_10, %c0_11] : memref<8x128xf32, #tpu.memory_space<vmem>>, vector<8x128xf32>
      %c0_12 = arith.constant 0 : index
      %c0_13 = arith.constant 0 : index
      %13 = vector.load %arg5[%c0_12, %c0_13] : memref<8x128xf32, #tpu.memory_space<vmem>>, vector<8x128xf32>
      tpu.vector_store %arg5[%c0_12, %c0_13], %12 {strides = array<i32>} : memref<8x128xf32, #tpu.memory_space<vmem>>, vector<8x128xf32>,
    } else {
    }
    return
  }
  func.func @transform_0(%arg0: i32, %arg1: i32, %arg2: i32) -> (i32, i32) {
    %c0_i32 = arith.constant 0 : i32
    return %arg0, %arg2 : i32, i32
  }
  func.func @transform_1(%arg0: i32, %arg1: i32, %arg2: i32) -> (i32, i32) {
    %c0_i32 = arith.constant 0 : i32
    return %arg2, %arg1 : i32, i32
  }
  func.func @transform_2(%arg0: i32, %arg1: i32, %arg2: i32) -> (i32, i32) {
    %c0_i32 = arith.constant 0 : i32
    return %arg0, %arg1 : i32, i32
  }
}

</mosaic_0001>

<bundles_post_ra>
// kernel: tpu_custom_call.1
= control target key start
LH: loop header
LB: loop body
LE: loop exit
PB: predicated region body
PF: predicated region fallthrough
CT: control target
= control target key end

     0   :  { %7 = vsyncpa [#allocation4], 0  ;;  %s376_s0 = inlined_call_operand.hbm [shape: f32[8,128], index: 0, kind: input, shape index: {}]   ;;  %s377_s1 = inlined_call_operand.hbm [shape: f32[128,128], index: 1, kind: input, shape index: {}]   ;;  %s378_s2 = inlined_call_operand.hbm [shape: f32[8,128], index: 2, kind: output, shape index: {}]  }
   0x1   :  { %8 = vsyncpa [#allocation7], 0 }
   0x2   :  { %9 = vsyncpa [#allocation5], 0  ;;  %s310_s9 = smov [#allocation3]   ;;  %s311_s11 = smov [#allocation6]  }
   0x3   :  { %s16_s10 = sshll.u32 %s310_s9, 4  ;;  %s25_s12 = sshll.u32 %s311_s11, 4  ;;  %s17_s10 = int_to_ptr.vmem [resolvable:$true] %s16_s10  ;;  %s333_s12 = int_to_ptr.vmem [resolvable:$true] %s25_s12 }
   0x4   :  { %s238_s15 = scalar_lea.hbm %s376_s0, 128 }
   0x5   :  { %p239_p0 = scmp.ne.s32.totalorder %s376_s0, %s238_s15  ;;  %p242_p1 = scmp.lt.u32.totalorder %s238_s15, %s376_s0 }
   0x7   :  { %p244_p2 = pnand %p242_p1, %p239_p0 }
   0x9   :  { %247 = shalt.err (!%p244_p2)
}
   0xa   :  { %s248_s20 = scalar_lea.vmem %s17_s10, 128  ;;  %p253_p4 = scmp.lt.s32.totalorder %s17_s10, %s17_s10 }
   0xb   :  { %p249_p3 = scmp.ne.s32.totalorder %s17_s10, %s248_s20  ;;  %p254_p5 = scmp.lt.s32.totalorder %s248_s20, %s248_s20 }
   0xd   :  { %p255_p6 = por %p254_p5, %p253_p4 }
   0xf   :  { %p256_p7 = pnand %p255_p6, %p249_p3 }
  0x11   :  { %259 = shalt.err (!%p256_p7)
}
  0x12   :  { %19 = dma.hbm_to_vmem [thread:$0]  %s376_s0, 128, %s17_s10, [#allocation4]  }
  0x13   :  { %s260_s25 = scalar_lea.hbm %s377_s1, 2048 }
  0x14   :  { %p261_p8 = scmp.ne.s32.totalorder %s377_s1, %s260_s25  ;;  %p264_p9 = scmp.lt.u32.totalorder %s260_s25, %s377_s1 }
  0x16   :  { %p266_p10 = pnand %p264_p9, %p261_p8 }
  0x18   :  { %269 = shalt.err (!%p266_p10)
}
  0x19   :  { %s270_s30 = scalar_lea.vmem %s333_s12, 2048  ;;  %p275_p12 = scmp.lt.s32.totalorder %s333_s12, %s333_s12 }
  0x1a   :  { %p271_p11 = scmp.ne.s32.totalorder %s333_s12, %s270_s30  ;;  %p276_p13 = scmp.lt.s32.totalorder %s270_s30, %s270_s30 }
  0x1c   :  { %p277_p0 = por %p276_p13, %p275_p12 }
  0x1e   :  { %p278_p1 = pnand %p277_p0, %p271_p11 }
  0x20   :  { %281 = shalt.err (!%p278_p1)
}
  0x21   :  { %s312_s0 = smov 128   ;;  %s313_s3 = smov 8  }
  0x22   :  { %31 = dma.hbm_to_vmem [thread:$0]  %s377_s1, 2048, %s333_s12, [#allocation7], %s312_s0, %s312_s0, %s313_s3  }
  0x23   :  { %304 = dma.done.wait [#allocation4], 128  }
  0x24   :  { %305 = vsyncadd [#allocation4], 4294967168 }
  0x25   :  { %306 = dma.done.wait [#allocation7], 2048  }
  0x26   :  { %307 = vsyncadd [#allocation7], 4294965248  ;;  %v314_v0 = vmov 0.0|0.0   ;;  %vm315_vm0 = vmmov 0   ;;  %v316_v1 = vmov 0.0   ;;  %v45_v2 = vld [vmem:[#allocation6] sm:$0xff] }
  0x27   :  { %206 = vmatprep.subr.bf16.mxu0 %v314_v0  ;;  %203 = vmatprep.mubr.msk.f32.mxu0 %vm315_vm0, %v316_v1  ;;  %v46_v3 = vld [vmem:[#allocation6 + $0x8] sm:$0xff]  ;;  %v47_v4 = vld [vmem:[#allocation6 + $0x10] sm:$0xff]  ;;  %v48_v6 = vld [vmem:[#allocation6 + $0x18] sm:$0xff]  ;;  %s317_s1 = smov [#allocation8]  }
  0x28   :  { %v207_v5 = vpack.c.bf16 %v46_v3, %v45_v2  ;;  %v210_v7 = vpack.c.bf16 %v48_v6, %v47_v4  ;;  %v49_v8 = vld [vmem:[#allocation6 + $0x20] sm:$0xff]  ;;  %v50_v9 = vld [vmem:[#allocation6 + $0x28] sm:$0xff]  ;;  %v51_v11 = vld [vmem:[#allocation6 + $0x30] sm:$0xff]  ;;  %s144_s6 = sshll.u32 %s317_s1, 4  ;;  %s145_s6 = int_to_ptr.vmem [resolvable:$true] %s144_s6 }
  0x29   :  { %v213_v10 = vpack.c.bf16 %v50_v9, %v49_v8  ;;  %v52_v12 = vld [vmem:[#allocation6 + $0x38] sm:$0xff]  ;;  %v53_v14 = vld [vmem:[#allocation6 + $0x40] sm:$0xff]  ;;  %v54_v15 = vld [vmem:[#allocation6 + $0x48] sm:$0xff]  ;;  %s282_s7 = scalar_lea.vmem %s145_s6, 128  ;;  %p287_p3 = scmp.lt.s32.totalorder %s145_s6, %s145_s6 }
  0x2a   :  { %208 = vmatpush3.bf16.msra.mxu0 %v207_v5  ;;  %v216_v13 = vpack.c.bf16 %v52_v12, %v51_v11  ;;  %v219_v16 = vpack.c.bf16 %v54_v15, %v53_v14  ;;  %v55_v17 = vld [vmem:[#allocation6 + $0x50] sm:$0xff]  ;;  %v56_v18 = vld [vmem:[#allocation6 + $0x58] sm:$0xff]  ;;  %v57_v20 = vld [vmem:[#allocation6 + $0x60] sm:$0xff]  ;;  %p283_p2 = scmp.ne.s32.totalorder %s145_s6, %s282_s7  ;;  %p288_p4 = scmp.lt.s32.totalorder %s282_s7, %s282_s7 }
  0x2b   :  { %209 = vmatprep.subr.bf16.mxu0 %v314_v0  ;;  %v222_v19 = vpack.c.bf16 %v56_v18, %v55_v17  ;;  %v58_v21 = vld [vmem:[#allocation6 + $0x68] sm:$0xff]  ;;  %v59_v23 = vld [vmem:[#allocation6 + $0x70] sm:$0xff]  ;;  %v60_v24 = vld [vmem:[#allocation6 + $0x78] sm:$0xff] }
  0x2c   :  { %v225_v22 = vpack.c.bf16 %v58_v21, %v57_v20  ;;  %v228_v25 = vpack.c.bf16 %v60_v24, %v59_v23  ;;  %v44_v26 = vld [vmem:[#allocation3] sm:$0xff]  ;;  %p289_p5 = por %p288_p4, %p287_p3 }
  0x2e   :  { %211 = vmatpush3.bf16.msra.mxu0 %v210_v7  ;;  %p290_p6 = pnand %p289_p5, %p283_p2 }
  0x2f   :  { %212 = vmatprep.subr.bf16.mxu0 %v314_v0 }
  0x32   :  { %214 = vmatpush3.bf16.msra.mxu0 %v213_v10 }
  0x33   :  { %215 = vmatprep.subr.bf16.mxu0 %v314_v0 }
  0x36   :  { %217 = vmatpush3.bf16.msra.mxu0 %v216_v13 }
  0x37   :  { %218 = vmatprep.subr.bf16.mxu0 %v314_v0 }
  0x3a   :  { %220 = vmatpush3.bf16.msra.mxu0 %v219_v16 }
  0x3b   :  { %221 = vmatprep.subr.bf16.mxu0 %v314_v0 }
  0x3e   :  { %223 = vmatpush3.bf16.msra.mxu0 %v222_v19 }
  0x3f   :  { %224 = vmatprep.subr.bf16.mxu0 %v314_v0 }
  0x42   :  { %226 = vmatpush3.bf16.msra.mxu0 %v225_v22 }
  0x43   :  { %227 = vmatprep.subr.bf16.mxu0 %v314_v0 }
  0x46   :  { %229 = vmatpush3.bf16.msra.mxu0 %v228_v25 }
  0x49   :  { %204 = vmatmul.mubr.f32.vlgmr.msra.gmra.mrb[0].mxu0 %v44_v26 }
 0x11c   :  { %v127_v27 = vpop.f32.mrb[0].mxu0 }
 0x11d   :  { %137 = vst [vmem:[#allocation8] sm:$0xff] %v127_v27  ;;  %v205_v28 = vpop.f32.mrb[1].mxu0 }
 0x11e   :  { %293 = shalt.err (!%p290_p6)
}
 0x11f   :  { %s294_s10 = scalar_lea.hbm %s378_s2, 128 }
 0x120   :  { %p295_p7 = scmp.ne.s32.totalorder %s378_s2, %s294_s10  ;;  %p298_p8 = scmp.lt.u32.totalorder %s294_s10, %s378_s2 }
 0x122   :  { %p300_p9 = pnand %p298_p8, %p295_p7 }
 0x124   :  { %303 = shalt.err (!%p300_p9)
}
 0x125   :  { %147 = dma.vmem_to_hbm [thread:$0]  %s145_s6, 128, %s378_s2, [#allocation5]  }
 0x126   :  { %308 = dma.done.wait [#allocation5], 128  }
 0x127   :  { %309 = vsyncadd [#allocation5], 4294967168 }
 0x128   :  { %151 = vsyncpa [#allocation4], 1 }
 0x129   :  { %152 = vsyncpa [#allocation7], 1 }
 0x12a   :  { %153 = vsyncpa [#allocation5], 1 }

</bundles_post_ra>
